<compile_context>
chip_gen: v6e
topology: v6e:2x2x1
jax: 0.10.0
libtpu: 0.0.40
codegen_flags: <defaults>
</compile_context>

<pallas_src>
import functools

import jax
import jax.numpy as jnp
from jax.experimental import pallas as pl
from jax.experimental.pallas import tpu as pltpu


def _qnetwork_kernel(x_ref, w1_ref, b1_ref, w2_ref, b2_ref, w3_ref, b3_ref, o_ref):
    """Fused forward pass: relu(x@W1+b1) -> relu(@W2+b2) -> @W3+b3."""
    x = x_ref[...]

    h1 = jnp.dot(x, w1_ref[...], preferred_element_type=jnp.float32) + b1_ref[...]
    h1 = jnp.maximum(h1, 0.0).astype(w2_ref.dtype)   # cast back only if compute dtype < f32

    h2 = jnp.dot(h1, w2_ref[...], preferred_element_type=jnp.float32) + b2_ref[...]
    h2 = jnp.maximum(h2, 0.0).astype(w3_ref.dtype)

    out = jnp.dot(h2, w3_ref[...], preferred_element_type=jnp.float32) + b3_ref[...]
    o_ref[...] = out.astype(o_ref.dtype)


def _round_up(n, m):
    return ((n + m - 1) // m) * m


def _has_two_tensorcores():
    """True on v7x-class chips (2 TensorCores per chip)."""
    try:
        kind = jax.devices()[0].device_kind.lower()
    except Exception:  # pragma: no cover - defensive; detection is best-effort
        return False
    return "7" in kind


@functools.partial(jax.jit, static_argnames=("max_batch_tile", "compute_dtype"))
def qnetwork_forward(x, params, *, max_batch_tile=1024, compute_dtype=None):
    """Run the QNetwork forward pass with a single fused Pallas kernel.

    x:      [B, state_size] float32
    params: dict with w1 [S,64], b1 [1,64], w2 [64,64], b2 [1,64], w3 [64,A], b3 [1,A]
    compute_dtype: optional (e.g. jnp.bfloat16) dtype for x and the weights; accumulation,
                   bias-add and ReLU stay float32.
    """
    w1, b1 = params["w1"], params["b1"]
    w2, b2 = params["w2"], params["b2"]
    w3, b3 = params["w3"], params["b3"]

    B, S = x.shape
    H = w1.shape[1]
    A = w3.shape[1]
    out_dtype = x.dtype

    if compute_dtype is not None:
        x = x.astype(compute_dtype)
        w1 = w1.astype(compute_dtype)
        w2 = w2.astype(compute_dtype)
        w3 = w3.astype(compute_dtype)
        # biases stay f32: they are added to the f32 accumulator.

    # --- choose the batch tile (generation aware) ---------------------------
    if _has_two_tensorcores() and B >= 512:
        # v7x: shard the batch axis across both TensorCores; per-core tiles stay >= 256 rows.
        tb = min(max_batch_tile, _round_up(pl.cdiv(B, 2), 8))
        semantics = (pltpu.CORE_PARALLEL,)
    elif B <= 4 * max_batch_tile:
        # Single grid step: the block equals the full batch dim (always a legal BlockSpec),
        # so no batch padding and no per-step pipeline overhead.
        tb = B
        semantics = (pltpu.ARBITRARY,)
    else:
        tb = max_batch_tile
        semantics = (pltpu.ARBITRARY,)

    B_pad = _round_up(B, tb)
    if B_pad != B:
        x = jnp.pad(x, ((0, B_pad - B), (0, 0)))
    grid = (B_pad // tb,)

    # Weights/biases: same (only) block for every grid step.
    def _whole(*_):
        return (0, 0)

    out = pl.pallas_call(
        _qnetwork_kernel,
        out_shape=jax.ShapeDtypeStruct((B_pad, A), out_dtype),
        grid_spec=pltpu.PrefetchScalarGridSpec(
            num_scalar_prefetch=0,
            grid=grid,
            in_specs=[
                pl.BlockSpec((tb, S), lambda i: (i, 0)),  # x tile over batch (S = full dim)
                pl.BlockSpec((S, H), _whole),             # w1
                pl.BlockSpec((1, H), _whole),             # b1
                pl.BlockSpec((H, H), _whole),             # w2
                pl.BlockSpec((1, H), _whole),             # b2
                pl.BlockSpec((H, A), _whole),             # w3 (A = full dim, no lane padding)
                pl.BlockSpec((1, A), _whole),             # b3
            ],
            out_specs=pl.BlockSpec((tb, A), lambda i: (i, 0)),
        ),
        compiler_params=pltpu.CompilerParams(dimension_semantics=semantics),
    )(x, w1, b1, w2, b2, w3, b3)

    if B_pad != B:
        out = out[:B]
    return out


def init_qnetwork_params(key, state_size, action_size, hidden=64):
    """Deterministic init mimicking PyTorch nn.Linear default:
    U(-1/sqrt(fan_in), 1/sqrt(fan_in)) for both weight and bias."""
    keys = jax.random.split(key, 6)

    def linear(kw, kb, fan_in, fan_out):
        bound = 1.0 / jnp.sqrt(jnp.float32(fan_in))
        w = jax.random.uniform(kw, (fan_in, fan_out), jnp.float32, -bound, bound)
        b = jax.random.uniform(kb, (1, fan_out), jnp.float32, -bound, bound)
        return w, b

    w1, b1 = linear(keys[0], keys[1], state_size, hidden)
    w2, b2 = linear(keys[2], keys[3], hidden, hidden)
    w3, b3 = linear(keys[4], keys[5], hidden, action_size)
    return {"w1": w1, "b1": b1, "w2": w2, "b2": b2, "w3": w3, "b3": b3}


def qnetwork_ref(x, params):
    """Pure-JAX reference for correctness checking."""
    h = jnp.maximum(x @ params["w1"] + params["b1"], 0.0)
    h = jnp.maximum(h @ params["w2"] + params["b2"], 0.0)
    return h @ params["w3"] + params["b3"]


if __name__ == "__main__":
    key = jax.random.PRNGKey(0)
    k_params, k_x, k_params2, k_x2 = jax.random.split(key, 4)

    # Case 1: small, nicely-shaped problem (state_size=8, action_size=4, batch=8).
    params = init_qnetwork_params(k_params, 8, 4)
    x = jax.random.normal(k_x, (8, 8), dtype=jnp.float32)
    out = jax.block_until_ready(qnetwork_forward(x, params))
    ref = qnetwork_ref(x, params)
    assert out.shape == (8, 4)
    assert jnp.allclose(out, ref, atol=1e-5, rtol=1e-5), "mismatch vs reference (case 1)"

    # Case 2: ragged shapes (banana env: state_size=37, action_size=4, batch=20).
    # Exercises the un-padded ragged S / A / batch paths.
    params2 = init_qnetwork_params(k_params2, 37, 4)
    x2 = jax.random.normal(k_x2, (20, 37), dtype=jnp.float32)
    out2 = jax.block_until_ready(qnetwork_forward(x2, params2))
    ref2 = qnetwork_ref(x2, params2)
    assert out2.shape == (20, 4)
    assert jnp.allclose(out2, ref2, atol=1e-5, rtol=1e-5), "mismatch vs reference (case 2)"

    # Case 3: optional bf16 compute path (f32 accumulation), relaxed tolerance.
    out3 = jax.block_until_ready(
        qnetwork_forward(x2, params2, compute_dtype=jnp.bfloat16)
    )
    assert out3.shape == (20, 4)
    assert jnp.allclose(out3, ref2, atol=5e-2, rtol=5e-2), "mismatch vs reference (case 3, bf16)"

    print("KERNEL_OK")
</pallas_src>

<mosaic_0001>
module attributes {stable_mosaic.version = 11 : i64} {
  func.func @_qnetwork_kernel(%arg0: i32, %arg1: memref<8x8xf32, #tpu.memory_space<vmem>>, %arg2: memref<8x64xf32, #tpu.memory_space<vmem>>, %arg3: memref<1x64xf32, #tpu.memory_space<vmem>>, %arg4: memref<64x64xf32, #tpu.memory_space<vmem>>, %arg5: memref<1x64xf32, #tpu.memory_space<vmem>>, %arg6: memref<64x4xf32, #tpu.memory_space<vmem>>, %arg7: memref<1x4xf32, #tpu.memory_space<vmem>>, %arg8: memref<8x4xf32, #tpu.memory_space<vmem>>) attributes {dimension_semantics = [#tpu.dimension_semantics<arbitrary>], iteration_bounds = array<i64: 1>, scalar_prefetch = 0 : i64, scratch_operands = 0 : i64, tpu.core_type = #tpu.core_type<tc>, window_params = [{transform_indices = @transform_0, window_bounds = array<i64: 8, 8>}, {pipeline_mode = #tpu.pipeline_mode<synchronous>, transform_indices = @transform_1, window_bounds = array<i64: 8, 64>}, {pipeline_mode = #tpu.pipeline_mode<synchronous>, transform_indices = @transform_2, window_bounds = array<i64: 1, 64>}, {pipeline_mode = #tpu.pipeline_mode<synchronous>, transform_indices = @transform_3, window_bounds = array<i64: 64, 64>}, {pipeline_mode = #tpu.pipeline_mode<synchronous>, transform_indices = @transform_4, window_bounds = array<i64: 1, 64>}, {pipeline_mode = #tpu.pipeline_mode<synchronous>, transform_indices = @transform_5, window_bounds = array<i64: 64, 4>}, {pipeline_mode = #tpu.pipeline_mode<synchronous>, transform_indices = @transform_6, window_bounds = array<i64: 1, 4>}, {transform_indices = @transform_7, window_bounds = array<i64: 8, 4>}]} {
    %c0 = arith.constant 0 : index
    %c0_0 = arith.constant 0 : index
    %0 = vector.load %arg1[%c0, %c0_0] : memref<8x8xf32, #tpu.memory_space<vmem>>, vector<8x8xf32>
    %c0_1 = arith.constant 0 : index
    %c0_2 = arith.constant 0 : index
    %1 = vector.load %arg2[%c0_1, %c0_2] : memref<8x64xf32, #tpu.memory_space<vmem>>, vector<8x64xf32>
    %cst = arith.constant dense<0.000000e+00> : vector<8x64xf32>
    %2 = tpu.matmul %0, %1, %cst {dimension_numbers = #tpu.dot_dimension_numbers<[1], [0], [0], [1], [0, 0, 1, 1], [], []>} : vector<8x8xf32>, vector<8x64xf32>, vector<8x64xf32> -> vector<8x64xf32>
    %c0_3 = arith.constant 0 : index
    %c0_4 = arith.constant 0 : index
    %3 = vector.load %arg3[%c0_3, %c0_4] : memref<1x64xf32, #tpu.memory_space<vmem>>, vector<1x64xf32>
    %4 = vector.broadcast %3 : vector<1x64xf32> to vector<8x64xf32>
    %5 = arith.addf %2, %4 : vector<8x64xf32>
    %cst_5 = arith.constant 0.000000e+00 : f32
    %6 = vector.broadcast %cst_5 : f32 to vector<8x64xf32>
    %7 = arith.maximumf %5, %6 : vector<8x64xf32>
    %c0_6 = arith.constant 0 : index
    %c0_7 = arith.constant 0 : index
    %8 = vector.load %arg4[%c0_6, %c0_7] : memref<64x64xf32, #tpu.memory_space<vmem>>, vector<64x64xf32>
    %cst_8 = arith.constant dense<0.000000e+00> : vector<8x64xf32>
    %9 = tpu.matmul %7, %8, %cst_8 {dimension_numbers = #tpu.dot_dimension_numbers<[1], [0], [0], [1], [0, 0, 1, 1], [], []>} : vector<8x64xf32>, vector<64x64xf32>, vector<8x64xf32> -> vector<8x64xf32>
    %c0_9 = arith.constant 0 : index
    %c0_10 = arith.constant 0 : index
    %10 = vector.load %arg5[%c0_9, %c0_10] : memref<1x64xf32, #tpu.memory_space<vmem>>, vector<1x64xf32>
    %11 = vector.broadcast %10 : vector<1x64xf32> to vector<8x64xf32>
    %12 = arith.addf %9, %11 : vector<8x64xf32>
    %cst_11 = arith.constant 0.000000e+00 : f32
    %13 = vector.broadcast %cst_11 : f32 to vector<8x64xf32>
    %14 = arith.maximumf %12, %13 : vector<8x64xf32>
    %c0_12 = arith.constant 0 : index
    %c0_13 = arith.constant 0 : index
    %15 = vector.load %arg6[%c0_12, %c0_13] : memref<64x4xf32, #tpu.memory_space<vmem>>, vector<64x4xf32>
    %cst_14 = arith.constant dense<0.000000e+00> : vector<8x4xf32>
    %16 = tpu.matmul %14, %15, %cst_14 {dimension_numbers = #tpu.dot_dimension_numbers<[1], [0], [0], [1], [0, 0, 1, 1], [], []>} : vector<8x64xf32>, vector<64x4xf32>, vector<8x4xf32> -> vector<8x4xf32>
    %c0_15 = arith.constant 0 : index
    %c0_16 = arith.constant 0 : index
    %17 = vector.load %arg7[%c0_15, %c0_16] : memref<1x4xf32, #tpu.memory_space<vmem>>, vector<1x4xf32>
    %18 = vector.broadcast %17 : vector<1x4xf32> to vector<8x4xf32>
    %19 = arith.addf %16, %18 : vector<8x4xf32>
    %c0_17 = arith.constant 0 : index
    %c0_18 = arith.constant 0 : index
    %20 = vector.load %arg8[%c0_17, %c0_18] : memref<8x4xf32, #tpu.memory_space<vmem>>, vector<8x4xf32>
    tpu.vector_store %arg8[%c0_17, %c0_18], %19 {strides = array<i32>} : memref<8x4xf32, #tpu.memory_space<vmem>>, vector<8x4xf32>,
    return
  }
  func.func @transform_0(%arg0: i32) -> (i32, i32) {
    %c0_i32 = arith.constant 0 : i32
    %c0_i32_0 = arith.constant 0 : i32
    return %arg0, %c0_i32 : i32, i32
  }
  func.func @transform_1(%arg0: i32) -> (i32, i32) {
    %c0_i32 = arith.constant 0 : i32
    %c0_i32_0 = arith.constant 0 : i32
    %c0_i32_1 = arith.constant 0 : i32
    return %c0_i32, %c0_i32_0 : i32, i32
  }
  func.func @transform_2(%arg0: i32) -> (i32, i32) {
    %c0_i32 = arith.constant 0 : i32
    %c0_i32_0 = arith.constant 0 : i32
    %c0_i32_1 = arith.constant 0 : i32
    return %c0_i32, %c0_i32_0 : i32, i32
  }
  func.func @transform_3(%arg0: i32) -> (i32, i32) {
    %c0_i32 = arith.constant 0 : i32
    %c0_i32_0 = arith.constant 0 : i32
    %c0_i32_1 = arith.constant 0 : i32
    return %c0_i32, %c0_i32_0 : i32, i32
  }
  func.func @transform_4(%arg0: i32) -> (i32, i32) {
    %c0_i32 = arith.constant 0 : i32
    %c0_i32_0 = arith.constant 0 : i32
    %c0_i32_1 = arith.constant 0 : i32
    return %c0_i32, %c0_i32_0 : i32, i32
  }
  func.func @transform_5(%arg0: i32) -> (i32, i32) {
    %c0_i32 = arith.constant 0 : i32
    %c0_i32_0 = arith.constant 0 : i32
    %c0_i32_1 = arith.constant 0 : i32
    return %c0_i32, %c0_i32_0 : i32, i32
  }
  func.func @transform_6(%arg0: i32) -> (i32, i32) {
    %c0_i32 = arith.constant 0 : i32
    %c0_i32_0 = arith.constant 0 : i32
    %c0_i32_1 = arith.constant 0 : i32
    return %c0_i32, %c0_i32_0 : i32, i32
  }
  func.func @transform_7(%arg0: i32) -> (i32, i32) {
    %c0_i32 = arith.constant 0 : i32
    %c0_i32_0 = arith.constant 0 : i32
    return %arg0, %c0_i32 : i32, i32
  }
}

</mosaic_0001>

<bundles_post_ra>
// kernel: qnetwork_forward.1
= control target key start
LH: loop header
LB: loop body
LE: loop exit
PB: predicated region body
PF: predicated region fallthrough
CT: control target
= control target key end

     0   :  { %12 = vsyncpa [#allocation3], 0  ;;  %s552_s0 = inlined_call_operand.vmem [shape: f32[8,8], index: 0, kind: input, shape index: {}]   ;;  %s553_s1 = inlined_call_operand.hbm [shape: f32[8,64], index: 1, kind: input, shape index: {}]   ;;  %s554_s2 = inlined_call_operand.vmem [shape: f32[1,64], index: 2, kind: input, shape index: {}]   ;;  %s555_s3 = inlined_call_operand.vmem [shape: f32[64,64], index: 3, kind: input, shape index: {}]   ;;  %s556_s4 = inlined_call_operand.vmem [shape: f32[1,64], index: 4, kind: input, shape index: {}]   ;;  %s557_s5 = inlined_call_operand.vmem [shape: f32[64,4], index: 5, kind: input, shape index: {}]   ;;  %s558_s6 = inlined_call_operand.hbm [shape: f32[1,4], index: 6, kind: input, shape index: {}]   ;;  %s559_s7 = inlined_call_operand.vmem [shape: f32[8,4], index: 7, kind: output, shape index: {}]  }
   0x1   :  { %13 = vsyncpa [#allocation5], 0  ;;  %s437_s24 = smov [#allocation2]   ;;  %s438_s26 = smov [#allocation4]  }
   0x2   :  { %s22_s25 = sshll.u32 %s437_s24, 4  ;;  %s40_s27 = sshll.u32 %s438_s26, 4  ;;  %s23_s25 = int_to_ptr.vmem [resolvable:$true] %s22_s25  ;;  %s41_s27 = int_to_ptr.vmem [resolvable:$true] %s40_s27 }
   0x3   :  { %s401_s28 = scalar_lea.vmem %s23_s25, 128  ;;  %p406_p1 = scmp.lt.s32.totalorder %s23_s25, %s23_s25 }
   0x4   :  { %p402_p0 = scmp.ne.s32.totalorder %s23_s25, %s401_s28  ;;  %p407_p2 = scmp.lt.s32.totalorder %s401_s28, %s401_s28 }
   0x6   :  { %p408_p3 = por %p407_p2, %p406_p1 }
   0x8   :  { %p409_p4 = pnand %p408_p3, %p402_p0 }
   0xa   :  { %412 = shalt.err (!%p409_p4)
}
   0xb   :  { %25 = dma.hbm_to_vmem [thread:$0]  %s553_s1, 128, %s23_s25, [#allocation3]  }
   0xc   :  { %s421_s8 = scalar_lea.vmem %s41_s27, 16  ;;  %s425_s9 = scalar_lea.vmem %s41_s27, 32 }
   0xd   :  { %p422_p5 = scmp.ne.s32.totalorder %s41_s27, %s421_s8  ;;  %p426_p6 = scmp.lt.s32.totalorder %s41_s27, %s41_s27 }
   0xe   :  { %p427_p7 = scmp.lt.s32.totalorder %s425_s9, %s421_s8 }
  0x10   :  { %p428_p8 = por %p427_p7, %p426_p6 }
  0x12   :  { %p429_p9 = pnand %p428_p8, %p422_p5 }
  0x14   :  { %432 = shalt.err (!%p429_p9)
}
  0x15   :  { %43 = dma.hbm_to_vmem [thread:$0]  %s558_s6, 16, %s41_s27, [#allocation5]  }
  0x16   :  { %433 = dma.done.wait [#allocation3], 128  }
  0x17   :  { %434 = vsyncadd [#allocation3], 4294967168 }
  0x18   :  { %435 = dma.done.wait [#allocation5], 16  }
  0x19   :  { %436 = vsyncadd [#allocation5], 4294967280  ;;  %v439_v0 = vmov 0.0   ;;  %vm440_vm0 = vmmov 0   ;;  %vm59_vm1 = vcmask 64512   ;;  %v51_v1 = vld [vmem:[#allocation2] sm:$0xff] }
  0x1a   :  { %346 = vmatprep.subr.mxu0 %v439_v0  ;;  %348 = vmatprep.mubr.msk.f32.mxu0 %vm440_vm0, %v439_v0  ;;  %v50_v2 = vld [vmem:[%s552_s0] sm:$0xff]  ;;  %v141_v3 = vld [vmem:[%s555_s3 + $0x38] sm:$0xff]  ;;  %v140_v4 = vld [vmem:[%s555_s3 + $0x30] sm:$0xff]  ;;  %vm149_vm2 = vcmask 523264   ;;  %vm312_vm3 = vcmask 31744  }
  0x1b   :  { %351 = vmatprep.subr.mxu1 %v439_v0  ;;  %367 = vmatprep.mubr.msk.f32.mxu1 %vm440_vm0, %v439_v0  ;;  %v139_v5 = vld [vmem:[%s555_s3 + $0x28] sm:$0xff]  ;;  %v138_v6 = vld [vmem:[%s555_s3 + $0x20] sm:$0xff]  ;;  %v137_v7 = vld [vmem:[%s555_s3 + $0x18] sm:$0xff] }
  0x1c   :  { %347 = vmatpush3.msra.mxu0 %v51_v1  ;;  %352 = vmatpush3.msra.mxu1 %v141_v3  ;;  %v136_v8 = vld [vmem:[%s555_s3 + $0x10] sm:$0xff]  ;;  %v135_v9 = vld [vmem:[%s555_s3 + $0x8] sm:$0xff]  ;;  %v134_v10 = vld [vmem:[%s555_s3] sm:$0xff] }
  0x1d   :  { %349 = vmatmul.mubr.msk.f32.vlgmr.msra.gmra.mxu0 %vm59_vm1, %v50_v2  ;;  %353 = vmatprep.subr.mxu1 %v439_v0  ;;  %v231_v11 = vld [vmem:[%s557_s5 + $0x38] sm:$0xff]  ;;  %v230_v12 = vld [vmem:[%s557_s5 + $0x30] sm:$0xff]  ;;  %v229_v13 = vld [vmem:[%s557_s5 + $0x28] sm:$0xff] }
  0x1e   :  { %354 = vmatpush3.msra.mxu1 %v140_v4  ;;  %370 = vmatprep.subr.mxu0 %v439_v0  ;;  %v228_v14 = vld [vmem:[%s557_s5 + $0x20] sm:$0xff]  ;;  %v227_v15 = vld [vmem:[%s557_s5 + $0x18] sm:$0xff]  ;;  %v226_v21 = vld [vmem:[%s557_s5 + $0x10] sm:$0xff] }
  0x1f   :  { %355 = vmatprep.subr.mxu1 %v439_v0  ;;  %386 = vmatprep.mubr.msk.f32.mxu0 %vm440_vm0, %v439_v0  ;;  %v320_v16 = vld [vmem:[%s554_s2] ss:$0 sm:$0xff]  ;;  %v225_v22 = vld [vmem:[%s557_s5 + $0x8] sm:$0xff] }
  0x20   :  { %356 = vmatpush3.msra.mxu1 %v139_v5  ;;  %371 = vmatpush3.msra.mxu0 %v231_v11  ;;  %v224_v23 = vld [vmem:[%s557_s5] sm:$0xff]  ;;  %v324_v29 = vld [vmem:[#allocation4] ss:$0 sm:$0xff] }
  0x21   :  { %357 = vmatprep.subr.mxu1 %v439_v0  ;;  %372 = vmatprep.subr.mxu0 %v439_v0  ;;  %v322_v24 = vld [vmem:[%s556_s4] ss:$0 sm:$0xff] }
  0x22   :  { %358 = vmatpush3.msra.mxu1 %v138_v6  ;;  %373 = vmatpush3.msra.mxu0 %v230_v12 }
  0x23   :  { %359 = vmatprep.subr.mxu1 %v439_v0  ;;  %374 = vmatprep.subr.mxu0 %v439_v0 }
  0x24   :  { %360 = vmatpush3.msra.mxu1 %v137_v7  ;;  %375 = vmatpush3.msra.mxu0 %v229_v13 }
  0x25   :  { %361 = vmatprep.subr.mxu1 %v439_v0  ;;  %376 = vmatprep.subr.mxu0 %v439_v0 }
  0x26   :  { %362 = vmatpush3.msra.mxu1 %v136_v8  ;;  %377 = vmatpush3.msra.mxu0 %v228_v14 }
  0x27   :  { %363 = vmatprep.subr.mxu1 %v439_v0  ;;  %378 = vmatprep.subr.mxu0 %v439_v0 }
  0x28   :  { %364 = vmatpush3.msra.mxu1 %v135_v9  ;;  %379 = vmatpush3.msra.mxu0 %v227_v15 }
  0x29   :  { %365 = vmatprep.subr.mxu1 %v439_v0  ;;  %380 = vmatprep.subr.mxu0 %v439_v0 }
  0x2a   :  { %366 = vmatpush3.msra.mxu1 %v134_v10  ;;  %381 = vmatpush3.msra.mxu0 %v226_v21 }
  0x2b   :  { %382 = vmatprep.subr.mxu0 %v439_v0 }
  0x2c   :  { %383 = vmatpush3.msra.mxu0 %v225_v22 }
  0x2d   :  { %384 = vmatprep.subr.mxu0 %v439_v0 }
  0x2e   :  { %385 = vmatpush3.msra.mxu0 %v224_v23 }
  0xdd   :  { %v129_v17 = vpop.f32.mrf.mxu0 }
  0xde   :  { %v130_v18 = vadd.f32 %v320_v16, %v129_v17 }
  0xdf   :  { %v350_v19 = vpop.f32.mrf.mxu0 }
  0xe0   :  { %v133_v20 = vmax.f32 %v130_v18, 0.0 }
  0xe2   :  { %368 = vmatmul.mubr.msk.f32.vlgmr.msra.gmra.mxu1 %vm149_vm2, %v133_v20 }
 0x1a2   :  { %v219_v25 = vpop.f32.mrf.mxu1 }
 0x1a3   :  { %v220_v26 = vadd.f32 %v322_v24, %v219_v25 }
 0x1a4   :  { %v369_v27 = vpop.f32.mrf.mxu1 }
 0x1a5   :  { %v223_v28 = vmax.f32 %v220_v26, 0.0 }
 0x1a7   :  { %387 = vmatmul.mubr.msk.f32.vlgmr.msra.gmra.mxu0 %vm149_vm2, %v223_v28 }
 0x267   :  { %v308_v30 = vpop.f32.mrf.mxu0 }
 0x268   :  { %v309_v31 = vadd.f32 %v324_v29, %v308_v30 }
 0x269   :  { %v388_v32 = vpop.f32.mrf.mxu0 }
 0x26a   :  { %313 = vst.msk [vmem:[%s559_s7] sm:$0xff] %vm312_vm3, %v309_v31 }
 0x26b   :  { %318 = vsyncpa [#allocation3], 1 }
 0x26c   :  { %319 = vsyncpa [#allocation5], 1 }

</bundles_post_ra>
